<compile_context>
chip_gen: v6e
topology: v6e:2x2x1
jax: 0.10.0
libtpu: 0.0.40
codegen_flags: <defaults>
</compile_context>

<pallas_src>
import math

import jax
import jax.numpy as jnp
from jax.experimental import pallas as pl
from jax.experimental.pallas import tpu as pltpu

H1, H2 = 400, 300        # hidden widths from the PyTorch module: make_fc(obs, [400, 300])
_LANE = 128
_SUBLANE = 8


def _round_up(n, m):
    return ((n + m - 1) // m) * m


def _actor_kernel(ms_ref, x_ref, w1_ref, b1_ref, w2_ref, b2_ref,
                  w3_ref, b3_ref, out_ref):
    """One batch tile of the Actor MLP (all three layers fused)."""
    max_action = ms_ref[0, 0]                      # SMEM scalar, f32

    # Layer 1: obs -> 512 (padded 400), ReLU.  bf16 x bf16 on MXU, f32 acc.
    h = jnp.dot(x_ref[...], w1_ref[...], preferred_element_type=jnp.float32)
    h = jnp.maximum(h + b1_ref[...], 0.0)

    # Layer 2: 512 -> 384 (padded 300), ReLU.
    h = jnp.dot(h.astype(w2_ref.dtype), w2_ref[...],
                preferred_element_type=jnp.float32)
    h = jnp.maximum(h + b2_ref[...], 0.0)

    # Action head: 384 -> 128 (padded act_dim), tanh * max_action.
    a = jnp.dot(h.astype(w3_ref.dtype), w3_ref[...],
                preferred_element_type=jnp.float32)
    a = max_action * jnp.tanh(a + b3_ref[...])

    out_ref[...] = a.astype(out_ref.dtype)


def init_actor_params(key, obs_dim, act_dim):
    """Master f32 params, PyTorch nn.Linear default init (uniform ±1/sqrt(fan_in)).
    Stored as (in_features, out_features) so the kernel computes x @ W + b."""
    keys = jax.random.split(key, 6)

    def linear(kw, kb, fan_in, fan_out):
        bound = 1.0 / math.sqrt(fan_in)
        W = jax.random.uniform(kw, (fan_in, fan_out), jnp.float32, -bound, bound)
        b = jax.random.uniform(kb, (fan_out,), jnp.float32, -bound, bound)
        return W, b

    W1, b1 = linear(keys[0], keys[1], obs_dim, H1)
    W2, b2 = linear(keys[2], keys[3], H1, H2)
    W3, b3 = linear(keys[4], keys[5], H2, act_dim)
    return {"W1": W1, "b1": b1, "W2": W2, "b2": b2, "W3": W3, "b3": b3}


def prepare_actor_params(params, obs_dim, act_dim, compute_dtype=jnp.bfloat16):
    """Zero-pad every feature dim to a multiple of 128 (lane-dense) and cast
    the weight matrices to compute_dtype (bf16 halves the weight DMA).
    Biases stay f32."""
    obs_p = _round_up(obs_dim, _LANE)
    h1_p = _round_up(H1, _LANE)     # 512
    h2_p = _round_up(H2, _LANE)     # 384
    act_p = _round_up(act_dim, _LANE)

    def pad_w(w, r, c):
        out = jnp.zeros((r, c), jnp.float32)
        return out.at[: w.shape[0], : w.shape[1]].set(w).astype(compute_dtype)

    def pad_b(b, c):
        out = jnp.zeros((1, c), jnp.float32)
        return out.at[0, : b.shape[0]].set(b)

    padded = {
        "W1": pad_w(params["W1"], obs_p, h1_p), "b1": pad_b(params["b1"], h1_p),
        "W2": pad_w(params["W2"], h1_p, h2_p), "b2": pad_b(params["b2"], h2_p),
        "W3": pad_w(params["W3"], h2_p, act_p), "b3": pad_b(params["b3"], act_p),
    }
    dims = {"obs": obs_dim, "act": act_dim,
            "obs_p": obs_p, "h1_p": h1_p, "h2_p": h2_p, "act_p": act_p}
    return padded, dims


def actor_forward(x, padded_params, dims, max_action, *, batch_tile=256):
    """x: (B, obs_dim) f32. Returns (B, act_dim) f32."""
    obs_dim, act_dim = dims["obs"], dims["act"]
    obs_p, h1_p = dims["obs_p"], dims["h1_p"]
    h2_p, act_p = dims["h2_p"], dims["act_p"]

    w1, b1 = padded_params["W1"], padded_params["b1"]
    w2, b2 = padded_params["W2"], padded_params["b2"]
    w3, b3 = padded_params["W3"], padded_params["b3"]
    cdt = w1.dtype

    B = x.shape[0]
    B_pad = _round_up(B, _SUBLANE)
    tile_b = min(B_pad, batch_tile)
    B_pad = _round_up(B_pad, tile_b)
    grid = (B_pad // tile_b,)

    x_p = jnp.zeros((B_pad, obs_p), jnp.float32).at[:B, :obs_dim].set(x).astype(cdt)
    ms = jnp.full((1, 1), max_action, jnp.float32)

    wbytes = w1.dtype.itemsize
    cost = pl.CostEstimate(
        flops=2 * B_pad * (obs_p * h1_p + h1_p * h2_p + h2_p * act_p),
        transcendentals=B_pad * act_p,                      # tanh
        bytes_accessed=(B_pad * obs_p * wbytes
                        + (obs_p * h1_p + h1_p * h2_p + h2_p * act_p) * wbytes
                        + (h1_p + h2_p + act_p) * 4
                        + B_pad * act_p * 4),
    )

    const = lambda i: (0, 0)     # weights/biases: same block every batch tile
    out = pl.pallas_call(
        _actor_kernel,
        out_shape=jax.ShapeDtypeStruct((B_pad, act_p), jnp.float32),
        grid=grid,
        in_specs=[
            pl.BlockSpec(memory_space=pltpu.MemorySpace.SMEM),   # max_action
            pl.BlockSpec((tile_b, obs_p), lambda i: (i, 0)),     # x tile
            pl.BlockSpec((obs_p, h1_p), const),
            pl.BlockSpec((1, h1_p), const),
            pl.BlockSpec((h1_p, h2_p), const),
            pl.BlockSpec((1, h2_p), const),
            pl.BlockSpec((h2_p, act_p), const),
            pl.BlockSpec((1, act_p), const),
        ],
        out_specs=pl.BlockSpec((tile_b, act_p), lambda i: (i, 0)),
        compiler_params=pltpu.CompilerParams(
            dimension_semantics=("parallel",)),
        cost_estimate=cost,
    )(ms, x_p, w1, b1, w2, b2, w3, b3)

    return out[:B, :act_dim]


def actor_reference(x, padded_params, dims, max_action):
    """Pure-JAX reference mirroring the kernel math exactly (same padded
    bf16 weights, f32 accumulation, bf16 rounding at MXU boundaries)."""
    cdt = padded_params["W1"].dtype
    B, obs_dim = x.shape
    x_p = jnp.zeros((B, dims["obs_p"]), jnp.float32).at[:, :obs_dim].set(x).astype(cdt)

    h = jnp.dot(x_p, padded_params["W1"], preferred_element_type=jnp.float32)
    h = jnp.maximum(h + padded_params["b1"], 0.0)
    h = jnp.dot(h.astype(cdt), padded_params["W2"], preferred_element_type=jnp.float32)
    h = jnp.maximum(h + padded_params["b2"], 0.0)
    a = jnp.dot(h.astype(cdt), padded_params["W3"], preferred_element_type=jnp.float32)
    a = max_action * jnp.tanh(a + padded_params["b3"])
    return a[:, : dims["act"]]


if __name__ == "__main__":
    key = jax.random.PRNGKey(0)
    k_param, k_x = jax.random.split(key)

    batch = 8
    obs_dim = 24       # flatdim(env.observation_space)
    act_dim = 6        # flatdim(env.action_space)
    max_action = 2.0   # env.action_space.high[0]

    params = init_actor_params(k_param, obs_dim, act_dim)
    padded, dims = prepare_actor_params(params, obs_dim, act_dim)
    x = jax.random.normal(k_x, (batch, obs_dim), jnp.float32)

    out = actor_forward(x, padded, dims, max_action)
    out = jax.block_until_ready(out)
    assert out.shape == (batch, act_dim)

    ref = actor_reference(x, padded, dims, max_action)
    assert jnp.allclose(out, ref, atol=2e-3, rtol=2e-3), "mismatch vs reference"

    print("KERNEL_OK")
</pallas_src>

<mosaic_0001>
module attributes {stable_mosaic.version = 11 : i64} {
  func.func @_actor_kernel(%arg0: i32, %arg1: memref<1x1xf32, #tpu.memory_space<smem>>, %arg2: memref<8x128xbf16, #tpu.memory_space<vmem>>, %arg3: memref<128x512xbf16, #tpu.memory_space<vmem>>, %arg4: memref<1x512xf32, #tpu.memory_space<vmem>>, %arg5: memref<512x384xbf16, #tpu.memory_space<vmem>>, %arg6: memref<1x384xf32, #tpu.memory_space<vmem>>, %arg7: memref<384x128xbf16, #tpu.memory_space<vmem>>, %arg8: memref<1x128xf32, #tpu.memory_space<vmem>>, %arg9: memref<8x128xf32, #tpu.memory_space<vmem>>) attributes {dimension_semantics = [#tpu.dimension_semantics<parallel>], iteration_bounds = array<i64: 1>, scalar_prefetch = 0 : i64, scratch_operands = 0 : i64, tpu.core_type = #tpu.core_type<tc>, window_params = [{transform_indices = @transform_0, window_bounds = array<i64: 1, 1>}, {transform_indices = @transform_1, window_bounds = array<i64: 8, 128>}, {pipeline_mode = #tpu.pipeline_mode<synchronous>, transform_indices = @transform_2, window_bounds = array<i64: 128, 512>}, {pipeline_mode = #tpu.pipeline_mode<synchronous>, transform_indices = @transform_3, window_bounds = array<i64: 1, 512>}, {pipeline_mode = #tpu.pipeline_mode<synchronous>, transform_indices = @transform_4, window_bounds = array<i64: 512, 384>}, {pipeline_mode = #tpu.pipeline_mode<synchronous>, transform_indices = @transform_5, window_bounds = array<i64: 1, 384>}, {pipeline_mode = #tpu.pipeline_mode<synchronous>, transform_indices = @transform_6, window_bounds = array<i64: 384, 128>}, {pipeline_mode = #tpu.pipeline_mode<synchronous>, transform_indices = @transform_7, window_bounds = array<i64: 1, 128>}, {transform_indices = @transform_8, window_bounds = array<i64: 8, 128>}]} {
    %c0 = arith.constant 0 : index
    %c0_0 = arith.constant 0 : index
    %0 = memref.load %arg1[%c0, %c0_0] : memref<1x1xf32, #tpu.memory_space<smem>>
    %c0_1 = arith.constant 0 : index
    %c0_2 = arith.constant 0 : index
    %1 = vector.load %arg2[%c0_1, %c0_2] : memref<8x128xbf16, #tpu.memory_space<vmem>>, vector<8x128xbf16>
    %c0_3 = arith.constant 0 : index
    %c0_4 = arith.constant 0 : index
    %2 = vector.load %arg3[%c0_3, %c0_4] : memref<128x512xbf16, #tpu.memory_space<vmem>>, vector<128x512xbf16>
    %cst = arith.constant dense<0.000000e+00> : vector<8x512xf32>
    %3 = tpu.matmul %1, %2, %cst {dimension_numbers = #tpu.dot_dimension_numbers<[1], [0], [0], [1], [0, 0, 1, 1], [], []>} : vector<8x128xbf16>, vector<128x512xbf16>, vector<8x512xf32> -> vector<8x512xf32>
    %c0_5 = arith.constant 0 : index
    %c0_6 = arith.constant 0 : index
    %4 = vector.load %arg4[%c0_5, %c0_6] : memref<1x512xf32, #tpu.memory_space<vmem>>, vector<1x512xf32>
    %5 = vector.broadcast %4 : vector<1x512xf32> to vector<8x512xf32>
    %6 = arith.addf %3, %5 : vector<8x512xf32>
    %cst_7 = arith.constant 0.000000e+00 : f32
    %7 = vector.broadcast %cst_7 : f32 to vector<8x512xf32>
    %8 = arith.maximumf %6, %7 : vector<8x512xf32>
    %9 = arith.truncf %8 : vector<8x512xf32> to vector<8x512xbf16>
    %c0_8 = arith.constant 0 : index
    %c0_9 = arith.constant 0 : index
    %10 = vector.load %arg5[%c0_8, %c0_9] : memref<512x384xbf16, #tpu.memory_space<vmem>>, vector<512x384xbf16>
    %cst_10 = arith.constant dense<0.000000e+00> : vector<8x384xf32>
    %11 = tpu.matmul %9, %10, %cst_10 {dimension_numbers = #tpu.dot_dimension_numbers<[1], [0], [0], [1], [0, 0, 1, 1], [], []>} : vector<8x512xbf16>, vector<512x384xbf16>, vector<8x384xf32> -> vector<8x384xf32>
    %c0_11 = arith.constant 0 : index
    %c0_12 = arith.constant 0 : index
    %12 = vector.load %arg6[%c0_11, %c0_12] : memref<1x384xf32, #tpu.memory_space<vmem>>, vector<1x384xf32>
    %13 = vector.broadcast %12 : vector<1x384xf32> to vector<8x384xf32>
    %14 = arith.addf %11, %13 : vector<8x384xf32>
    %cst_13 = arith.constant 0.000000e+00 : f32
    %15 = vector.broadcast %cst_13 : f32 to vector<8x384xf32>
    %16 = arith.maximumf %14, %15 : vector<8x384xf32>
    %17 = arith.truncf %16 : vector<8x384xf32> to vector<8x384xbf16>
    %c0_14 = arith.constant 0 : index
    %c0_15 = arith.constant 0 : index
    %18 = vector.load %arg7[%c0_14, %c0_15] : memref<384x128xbf16, #tpu.memory_space<vmem>>, vector<384x128xbf16>
    %cst_16 = arith.constant dense<0.000000e+00> : vector<8x128xf32>
    %19 = tpu.matmul %17, %18, %cst_16 {dimension_numbers = #tpu.dot_dimension_numbers<[1], [0], [0], [1], [0, 0, 1, 1], [], []>} : vector<8x384xbf16>, vector<384x128xbf16>, vector<8x128xf32> -> vector<8x128xf32>
    %c0_17 = arith.constant 0 : index
    %c0_18 = arith.constant 0 : index
    %20 = vector.load %arg8[%c0_17, %c0_18] : memref<1x128xf32, #tpu.memory_space<vmem>>, vector<1x128xf32>
    %21 = vector.broadcast %20 : vector<1x128xf32> to vector<8x128xf32>
    %22 = arith.addf %19, %21 : vector<8x128xf32>
    %23 = math.tanh %22 : vector<8x128xf32>
    %24 = vector.broadcast %0 : f32 to vector<8x128xf32>
    %25 = arith.mulf %24, %23 : vector<8x128xf32>
    %c0_19 = arith.constant 0 : index
    %c0_20 = arith.constant 0 : index
    %26 = vector.load %arg9[%c0_19, %c0_20] : memref<8x128xf32, #tpu.memory_space<vmem>>, vector<8x128xf32>
    tpu.vector_store %arg9[%c0_19, %c0_20], %25 {strides = array<i32>} : memref<8x128xf32, #tpu.memory_space<vmem>>, vector<8x128xf32>,
    return
  }
  func.func @transform_0(%arg0: i32) -> (i32, i32) {
    %c0_i32 = arith.constant 0 : i32
    %c0_i32_0 = arith.constant 0 : i32
    %c0_i32_1 = arith.constant 0 : i32
    return %c0_i32, %c0_i32_0 : i32, i32
  }
  func.func @transform_1(%arg0: i32) -> (i32, i32) {
    %c0_i32 = arith.constant 0 : i32
    %c0_i32_0 = arith.constant 0 : i32
    return %arg0, %c0_i32 : i32, i32
  }
  func.func @transform_2(%arg0: i32) -> (i32, i32) {
    %c0_i32 = arith.constant 0 : i32
    %c0_i32_0 = arith.constant 0 : i32
    %c0_i32_1 = arith.constant 0 : i32
    return %c0_i32, %c0_i32_0 : i32, i32
  }
  func.func @transform_3(%arg0: i32) -> (i32, i32) {
    %c0_i32 = arith.constant 0 : i32
    %c0_i32_0 = arith.constant 0 : i32
    %c0_i32_1 = arith.constant 0 : i32
    return %c0_i32, %c0_i32_0 : i32, i32
  }
  func.func @transform_4(%arg0: i32) -> (i32, i32) {
    %c0_i32 = arith.constant 0 : i32
    %c0_i32_0 = arith.constant 0 : i32
    %c0_i32_1 = arith.constant 0 : i32
    return %c0_i32, %c0_i32_0 : i32, i32
  }
  func.func @transform_5(%arg0: i32) -> (i32, i32) {
    %c0_i32 = arith.constant 0 : i32
    %c0_i32_0 = arith.constant 0 : i32
    %c0_i32_1 = arith.constant 0 : i32
    return %c0_i32, %c0_i32_0 : i32, i32
  }
  func.func @transform_6(%arg0: i32) -> (i32, i32) {
    %c0_i32 = arith.constant 0 : i32
    %c0_i32_0 = arith.constant 0 : i32
    %c0_i32_1 = arith.constant 0 : i32
    return %c0_i32, %c0_i32_0 : i32, i32
  }
  func.func @transform_7(%arg0: i32) -> (i32, i32) {
    %c0_i32 = arith.constant 0 : i32
    %c0_i32_0 = arith.constant 0 : i32
    %c0_i32_1 = arith.constant 0 : i32
    return %c0_i32, %c0_i32_0 : i32, i32
  }
  func.func @transform_8(%arg0: i32) -> (i32, i32) {
    %c0_i32 = arith.constant 0 : i32
    %c0_i32_0 = arith.constant 0 : i32
    return %arg0, %c0_i32 : i32, i32
  }
}

</mosaic_0001>

<bundles_post_ra>
// kernel: tpu_custom_call.1
= control target key start
LH: loop header
LB: loop body
LE: loop exit
PB: predicated region body
PF: predicated region fallthrough
CT: control target
= control target key end

     0   :  { %14 = vsyncpa [#allocation4], 0  ;;  %s2200_s0 = inlined_call_operand.<no memory space> [shape: f32[1,1], index: 0, kind: input, shape index: {}]   ;;  %s2201_s1 = inlined_call_operand.hbm [shape: bf16[8,128], index: 1, kind: input, shape index: {}]   ;;  %s2202_s2 = inlined_call_operand.hbm [shape: bf16[128,512], index: 2, kind: input, shape index: {}]   ;;  %s2203_s3 = inlined_call_operand.vmem [shape: f32[1,512], index: 3, kind: input, shape index: {}]   ;;  %s2204_s4 = inlined_call_operand.hbm [shape: bf16[512,384], index: 4, kind: input, shape index: {}]   ;;  %s2205_s5 = inlined_call_operand.vmem [shape: f32[1,384], index: 5, kind: input, shape index: {}]   ;;  %s2206_s6 = inlined_call_operand.hbm [shape: bf16[384,128], index: 6, kind: input, shape index: {}]   ;;  %s2207_s7 = inlined_call_operand.vmem [shape: f32[1,128], index: 7, kind: input, shape index: {}]   ;;  %s2208_s8 = inlined_call_operand.hbm [shape: f32[8,128], index: 8, kind: output, shape index: {}]  }
   0x1   :  { %15 = vsyncpa [#allocation7], 0 }
   0x2   :  { %16 = vsyncpa [#allocation10], 0 }
   0x3   :  { %17 = vsyncpa [#allocation5], 0  ;;  %s2088_s27 = smov [#allocation6]  }
   0x4   :  { %s35_s28 = sshll.u32 %s2088_s27, 4  ;;  %s36_s28 = int_to_ptr.vmem [resolvable:$true] %s35_s28 }
   0x5   :  { %s1988_s29 = scalar_lea.vmem %s36_s28, 4096  ;;  %p1993_p1 = scmp.lt.s32.totalorder %s36_s28, %s36_s28 }
   0x6   :  { %p1989_p0 = scmp.ne.s32.totalorder %s36_s28, %s1988_s29  ;;  %p1994_p2 = scmp.lt.s32.totalorder %s1988_s29, %s1988_s29 }
   0x8   :  { %p1995_p3 = por %p1994_p2, %p1993_p1 }
   0xa   :  { %p1996_p4 = pnand %p1995_p3, %p1989_p0 }
   0xc   :  { %1999 = shalt.err (!%p1996_p4)
}
   0xd   :  { %s2089_s30 = smov 256   ;;  %s2090_s9 = smov 16  }
   0xe   :  { %41 = dma.hbm_to_vmem [thread:$0]  %s2202_s2, 4096, %s36_s28, [#allocation7], %s2089_s30, %s2089_s30, %s2090_s9  }
   0xf   :  { %s2091_s12 = smov [#allocation3]   ;;  %s2092_s14 = smov [#allocation8]  }
  0x10   :  { %s26_s13 = sshll.u32 %s2091_s12, 4  ;;  %s49_s15 = sshll.u32 %s2092_s14, 4  ;;  %s27_s13 = int_to_ptr.vmem [resolvable:$true] %s26_s13  ;;  %s50_s15 = int_to_ptr.vmem [resolvable:$true] %s49_s15 }
  0x11   :  { %s2008_s16 = scalar_lea.vmem %s27_s13, 64  ;;  %p2013_p6 = scmp.lt.s32.totalorder %s27_s13, %s27_s13 }
  0x12   :  { %p2009_p5 = scmp.ne.s32.totalorder %s27_s13, %s2008_s16  ;;  %p2014_p7 = scmp.lt.s32.totalorder %s2008_s16, %s2008_s16 }
  0x14   :  { %p2015_p8 = por %p2014_p7, %p2013_p6 }
  0x16   :  { %p2016_p9 = pnand %p2015_p8, %p2009_p5 }
  0x18   :  { %2019 = shalt.err (!%p2016_p9)
}
  0x19   :  { %29 = dma.hbm_to_vmem [thread:$0]  %s2201_s1, 64, %s27_s13, [#allocation4]  }
  0x1a   :  { %s2028_s19 = scalar_lea.vmem %s50_s15, 12288  ;;  %p2033_p11 = scmp.lt.s32.totalorder %s50_s15, %s50_s15 }
  0x1b   :  { %p2029_p10 = scmp.ne.s32.totalorder %s50_s15, %s2028_s19  ;;  %p2034_p12 = scmp.lt.s32.totalorder %s2028_s19, %s2028_s19 }
  0x1d   :  { %p2035_p13 = por %p2034_p12, %p2033_p11 }
  0x1f   :  { %p2036_p0 = pnand %p2035_p13, %p2029_p10 }
  0x21   :  { %2039 = shalt.err (!%p2036_p0)
}
  0x22   :  { %s2093_s2 = smov 192   ;;  %s2094_s20 = smov 12  }
  0x23   :  { %55 = dma.hbm_to_vmem [thread:$0]  %s2204_s4, 12288, %s50_s15, [#allocation7], %s2093_s2, %s2093_s2, %s2094_s20  }
  0x24   :  { %s2095_s23 = smov [#allocation9]  }
  0x25   :  { %s63_s24 = sshll.u32 %s2095_s23, 4  ;;  %s64_s24 = int_to_ptr.vmem [resolvable:$true] %s63_s24 }
  0x26   :  { %s2048_s25 = scalar_lea.vmem %s64_s24, 3072  ;;  %p2053_p2 = scmp.lt.s32.totalorder %s64_s24, %s64_s24 }
  0x27   :  { %p2049_p1 = scmp.ne.s32.totalorder %s64_s24, %s2048_s25  ;;  %p2054_p3 = scmp.lt.s32.totalorder %s2048_s25, %s2048_s25 }
  0x29   :  { %p2055_p4 = por %p2054_p3, %p2053_p2 }
  0x2b   :  { %p2056_p5 = pnand %p2055_p4, %p2049_p1 }
  0x2d   :  { %2059 = shalt.err (!%p2056_p5)
}
  0x2e   :  { %s2096_s1 = smov 64   ;;  %s2097_s26 = smov 4  }
  0x2f   :  { %69 = dma.hbm_to_vmem [thread:$0]  %s2206_s6, 3072, %s64_s24, [#allocation10], %s2096_s1, %s2096_s1, %s2097_s26  }
  0x30   :  { %2080 = dma.done.wait [#allocation4], 64  }
  0x31   :  { %2081 = vsyncadd [#allocation4], 4294967232 }
  0x32   :  { %2082 = dma.done.wait [#allocation7], 16384  }
  0x33   :  { %2083 = vsyncadd [#allocation7], 4294950912 }
  0x34   :  { %2084 = dma.done.wait [#allocation10], 3072  }
  0x35   :  { %2085 = vsyncadd [#allocation10], 4294964224  ;;  %v2098_v0 = vmov 0   ;;  %v1778_v1 = vld [vmem:[#allocation6 + $0xe4] ss:$16 sps:$4 sm:$0xff]   ;;  %vm2100_vm0 = vmmov 0  }
  0x36   :  { %333 = vmatprep.mubr.bf16.mxu0 %v2098_v0  ;;  %374 = vmatprep.mubr.bf16.mxu1 %v2098_v0  ;;  %v1780_v2 = vld [vmem:[#allocation6 + $0xec] ss:$16 sps:$4 sm:$0xff]   ;;  %v1782_v3 = vld [vmem:[#allocation6 + $0xe0] ss:$16 sps:$4 sm:$0xff]   ;;  %v1783_v4 = vld [vmem:[#allocation6 + $0xe8] ss:$16 sps:$4 sm:$0xff]  }
  0x37   :  { %301 = vmatprep.subr.bf16.mxu0 %v1778_v1  ;;  %342 = vmatprep.subr.bf16.mxu1 %v1780_v2  ;;  %v1784_v5 = vld [vmem:[#allocation6 + $0xc4] ss:$16 sps:$4 sm:$0xff]   ;;  %v1786_v6 = vld [vmem:[#allocation6 + $0xcc] ss:$16 sps:$4 sm:$0xff]   ;;  %v1788_v7 = vld [vmem:[#allocation6 + $0xc0] ss:$16 sps:$4 sm:$0xff]  }
  0x38   :  { %302 = vmatpush1.bf16.msra.mxu0 %v1782_v3  ;;  %343 = vmatpush1.bf16.msra.mxu1 %v1783_v4  ;;  %v1789_v8 = vld [vmem:[#allocation6 + $0xc8] ss:$16 sps:$4 sm:$0xff]   ;;  %v1790_v9 = vld [vmem:[#allocation6 + $0xa4] ss:$16 sps:$4 sm:$0xff]   ;;  %v1792_v10 = vld [vmem:[#allocation6 + $0xac] ss:$16 sps:$4 sm:$0xff]  }
  0x39   :  { %303 = vmatprep.subr.bf16.mxu0 %v1784_v5  ;;  %344 = vmatprep.subr.bf16.mxu1 %v1786_v6  ;;  %v1794_v11 = vld [vmem:[#allocation6 + $0xa0] ss:$16 sps:$4 sm:$0xff]   ;;  %v1795_v12 = vld [vmem:[#allocation6 + $0xa8] ss:$16 sps:$4 sm:$0xff]   ;;  %v1796_v13 = vld [vmem:[#allocation6 + $0x84] ss:$16 sps:$4 sm:$0xff]  }
  0x3a   :  { %v1798_v14 = vld [vmem:[#allocation6 + $0x8c] ss:$16 sps:$4 sm:$0xff]   ;;  %v1800_v15 = vld [vmem:[#allocation6 + $0x80] ss:$16 sps:$4 sm:$0xff]   ;;  %v1801_v16 = vld [vmem:[#allocation6 + $0x88] ss:$16 sps:$4 sm:$0xff]  }
  0x3b   :  { %v1802_v17 = vld [vmem:[#allocation6 + $0x64] ss:$16 sps:$4 sm:$0xff]   ;;  %v1804_v18 = vld [vmem:[#allocation6 + $0x6c] ss:$16 sps:$4 sm:$0xff]   ;;  %v1806_v19 = vld [vmem:[#allocation6 + $0x60] ss:$16 sps:$4 sm:$0xff]  }
  0x3c   :  { %304 = vmatpush1.bf16.msra.mxu0 %v1788_v7  ;;  %345 = vmatpush1.bf16.msra.mxu1 %v1789_v8  ;;  %v1807_v20 = vld [vmem:[#allocation6 + $0x68] ss:$16 sps:$4 sm:$0xff]   ;;  %v1808_v21 = vld [vmem:[#allocation6 + $0x44] ss:$16 sps:$4 sm:$0xff]   ;;  %v1810_v22 = vld [vmem:[#allocation6 + $0x4c] ss:$16 sps:$4 sm:$0xff]  }
  0x3d   :  { %305 = vmatprep.subr.bf16.mxu0 %v1790_v9  ;;  %346 = vmatprep.subr.bf16.mxu1 %v1792_v10  ;;  %v1812_v23 = vld [vmem:[#allocation6 + $0x40] ss:$16 sps:$4 sm:$0xff]   ;;  %v1813_v24 = vld [vmem:[#allocation6 + $0x48] ss:$16 sps:$4 sm:$0xff]   ;;  %v1814_v25 = vld [vmem:[#allocation6 + $0x24] ss:$16 sps:$4 sm:$0xff]  }
  0x3e   :  { %v1816_v26 = vld [vmem:[#allocation6 + $0x2c] ss:$16 sps:$4 sm:$0xff]   ;;  %v1818_v27 = vld [vmem:[#allocation6 + $0x20] ss:$16 sps:$4 sm:$0xff]   ;;  %v1819_v28 = vld [vmem:[#allocation6 + $0x28] ss:$16 sps:$4 sm:$0xff]  }
  0x3f   :  { %v1820_v29 = vld [vmem:[#allocation6 + $0x4] ss:$16 sps:$4 sm:$0xff]   ;;  %v1822_v30 = vld [vmem:[#allocation6 + $0xc] ss:$16 sps:$4 sm:$0xff]   ;;  %v1824_v31 = vld [vmem:[#allocation6] ss:$16 sps:$4 sm:$0xff]  }
  0x40   :  { %306 = vmatpush1.bf16.msra.mxu0 %v1794_v11  ;;  %347 = vmatpush1.bf16.msra.mxu1 %v1795_v12  ;;  %v1825_v32 = vld [vmem:[#allocation6 + $0x8] ss:$16 sps:$4 sm:$0xff]   ;;  %v86_v35 = vld [vmem:[#allocation3] sm:$0xf]  ;;  %v1834_v38 = vld [vmem:[#allocation8 + $0x94] ss:$12 sps:$4 sm:$0xff]  }
  0x41   :  { %307 = vmatprep.subr.bf16.mxu0 %v1796_v13  ;;  %348 = vmatprep.subr.bf16.mxu1 %v1798_v14  ;;  %v1828_v33 = vld [vmem:[#allocation8 + $0xac] ss:$12 sps:$4 sm:$0xff]   ;;  %v1826_v36 = vld [vmem:[#allocation8 + $0xa8] ss:$12 sps:$4 sm:$0xff]   ;;  %v1832_v40 = vld [vmem:[#allocation8 + $0x90] ss:$12 sps:$4 sm:$0xff]  }
  0x42   :  { %v1831_v34 = vld [vmem:[#allocation8 + $0x22c] ss:$12 sps:$4 sm:$0xff]   ;;  %v1829_v37 = vld [vmem:[#allocation8 + $0x228] ss:$12 sps:$4 sm:$0xff]   ;;  %v1835_v41 = vld [vmem:[#allocation8 + $0x210] ss:$12 sps:$4 sm:$0xff]  }
  0x43   :  { %v1837_v39 = vld [vmem:[#allocation8 + $0x214] ss:$12 sps:$4 sm:$0xff]   ;;  %v1840_v42 = vld [vmem:[#allocation8 + $0x7c] ss:$12 sps:$4 sm:$0xff]   ;;  %v1838_v44 = vld [vmem:[#allocation8 + $0x78] ss:$12 sps:$4 sm:$0xff]  }
  0x44   :  { %308 = vmatpush1.bf16.msra.mxu0 %v1800_v15  ;;  %349 = vmatpush1.bf16.msra.mxu1 %v1801_v16  ;;  %v1843_v43 = vld [vmem:[#allocation8 + $0x1fc] ss:$12 sps:$4 sm:$0xff]   ;;  %v1841_v45 = vld [vmem:[#allocation8 + $0x1f8] ss:$12 sps:$4 sm:$0xff]   ;;  %v1844_v48 = vld [vmem:[#allocation8 + $0x60] ss:$12 sps:$4 sm:$0xff]  }
  0x45   :  { %309 = vmatprep.subr.bf16.mxu0 %v1802_v17  ;;  %350 = vmatprep.subr.bf16.mxu1 %v1804_v18  ;;  %v1846_v46 = vld [vmem:[#allocation8 + $0x64] ss:$12 sps:$4 sm:$0xff]   ;;  %v1847_v49 = vld [vmem:[#allocation8 + $0x1e0] ss:$12 sps:$4 sm:$0xff]   ;;  %v1850_v52 = vld [vmem:[#allocation8 + $0x48] ss:$12 sps:$4 sm:$0xff]  }
  0x46   :  { %v1849_v47 = vld [vmem:[#allocation8 + $0x1e4] ss:$12 sps:$4 sm:$0xff]   ;;  %v1852_v50 = vld [vmem:[#allocation8 + $0x4c] ss:$12 sps:$4 sm:$0xff]   ;;  %v1853_v53 = vld [vmem:[#allocation8 + $0x1c8] ss:$12 sps:$4 sm:$0xff]  }
  0x47   :  { %v1855_v51 = vld [vmem:[#allocation8 + $0x1cc] ss:$12 sps:$4 sm:$0xff]   ;;  %v1858_v54 = vld [vmem:[#allocation8 + $0x34] ss:$12 sps:$4 sm:$0xff]   ;;  %v1856_v56 = vld [vmem:[#allocation8 + $0x30] ss:$12 sps:$4 sm:$0xff]  }
  0x48   :  { %310 = vmatpush1.bf16.msra.mxu0 %v1806_v19  ;;  %351 = vmatpush1.bf16.msra.mxu1 %v1807_v20  ;;  %v1861_v55 = vld [vmem:[#allocation8 + $0x1b4] ss:$12 sps:$4 sm:$0xff]   ;;  %v1859_v57 = vld [vmem:[#allocation8 + $0x1b0] ss:$12 sps:$4 sm:$0xff]   ;;  %v1862_v60 = vld [vmem:[#allocation8 + $0x18] ss:$12 sps:$4 sm:$0xff]  }
  0x49   :  { %311 = vmatprep.subr.bf16.mxu0 %v1808_v21  ;;  %352 = vmatprep.subr.bf16.mxu1 %v1810_v22  ;;  %v1864_v58 = vld [vmem:[#allocation8 + $0x1c] ss:$12 sps:$4 sm:$0xff]   ;;  %v1865_v61 = vld [vmem:[#allocation8 + $0x198] ss:$12 sps:$4 sm:$0xff]   ;;  %v1868_v0 = vld [vmem:[#allocation8] ss:$12 sps:$4 sm:$0xff]  }
  0x4a   :  { %v1867_v59 = vld [vmem:[#allocation8 + $0x19c] ss:$12 sps:$4 sm:$0xff]   ;;  %v1870_v62 = vld [vmem:[#allocation8 + $0x4] ss:$12 sps:$4 sm:$0xff]   ;;  %v1871_v1 = vld [vmem:[#allocation8 + $0x180] ss:$12 sps:$4 sm:$0xff]  }
  0x4b   :  { %v1873_v63 = vld [vmem:[#allocation8 + $0x184] ss:$12 sps:$4 sm:$0xff]   ;;  %v1876_v2 = vld [vmem:[#allocation8 + $0x16c] ss:$12 sps:$4 sm:$0xff]   ;;  %v1874_v4 = vld [vmem:[#allocation8 + $0x168] ss:$12 sps:$4 sm:$0xff]  }
  0x4c   :  { %312 = vmatpush1.bf16.msra.mxu0 %v1812_v23  ;;  %353 = vmatpush1.bf16.msra.mxu1 %v1813_v24  ;;  %v1879_v3 = vld [vmem:[#allocation8 + $0x2ec] ss:$12 sps:$4 sm:$0xff]   ;;  %v1877_v5 = vld [vmem:[#allocation8 + $0x2e8] ss:$12 sps:$4 sm:$0xff]   ;;  %v1880_v8 = vld [vmem:[#allocation8 + $0x150] ss:$12 sps:$4 sm:$0xff]  }
  0x4d   :  { %313 = vmatprep.subr.bf16.mxu0 %v1814_v25  ;;  %354 = vmatprep.subr.bf16.mxu1 %v1816_v26  ;;  %v1882_v6 = vld [vmem:[#allocation8 + $0x154] ss:$12 sps:$4 sm:$0xff]   ;;  %v1883_v9 = vld [vmem:[#allocation8 + $0x2d0] ss:$12 sps:$4 sm:$0xff]   ;;  %v1886_v12 = vld [vmem:[#allocation8 + $0x138] ss:$12 sps:$4 sm:$0xff]  }
  0x4e   :  { %v1885_v7 = vld [vmem:[#allocation8 + $0x2d4] ss:$12 sps:$4 sm:$0xff]   ;;  %v1888_v10 = vld [vmem:[#allocation8 + $0x13c] ss:$12 sps:$4 sm:$0xff]   ;;  %v1889_v13 = vld [vmem:[#allocation8 + $0x2b8] ss:$12 sps:$4 sm:$0xff]  }
  0x4f   :  { %v1891_v11 = vld [vmem:[#allocation8 + $0x2bc] ss:$12 sps:$4 sm:$0xff]   ;;  %v1894_v14 = vld [vmem:[#allocation8 + $0x124] ss:$12 sps:$4 sm:$0xff]   ;;  %v1892_v16 = vld [vmem:[#allocation8 + $0x120] ss:$12 sps:$4 sm:$0xff]  }
  0x50   :  { %314 = vmatpush1.bf16.msra.mxu0 %v1818_v27  ;;  %355 = vmatpush1.bf16.msra.mxu1 %v1819_v28  ;;  %v1897_v15 = vld [vmem:[#allocation8 + $0x2a4] ss:$12 sps:$4 sm:$0xff]   ;;  %v1895_v17 = vld [vmem:[#allocation8 + $0x2a0] ss:$12 sps:$4 sm:$0xff]   ;;  %v1898_v20 = vld [vmem:[#allocation8 + $0x108] ss:$12 sps:$4 sm:$0xff]  }
  0x51   :  { %315 = vmatprep.subr.bf16.mxu0 %v1820_v29  ;;  %356 = vmatprep.subr.bf16.mxu1 %v1822_v30  ;;  %v1900_v18 = vld [vmem:[#allocation8 + $0x10c] ss:$12 sps:$4 sm:$0xff]   ;;  %v1901_v21 = vld [vmem:[#allocation8 + $0x288] ss:$12 sps:$4 sm:$0xff]   ;;  %v1904_v24 = vld [vmem:[#allocation8 + $0xf0] ss:$12 sps:$4 sm:$0xff]  }
  0x52   :  { %v1903_v19 = vld [vmem:[#allocation8 + $0x28c] ss:$12 sps:$4 sm:$0xff]   ;;  %v1906_v22 = vld [vmem:[#allocation8 + $0xf4] ss:$12 sps:$4 sm:$0xff]   ;;  %v1907_v25 = vld [vmem:[#allocation8 + $0x270] ss:$12 sps:$4 sm:$0xff]  }
  0x53   :  { %v1909_v23 = vld [vmem:[#allocation8 + $0x274] ss:$12 sps:$4 sm:$0xff]   ;;  %v1912_v26 = vld [vmem:[#allocation8 + $0xdc] ss:$12 sps:$4 sm:$0xff]   ;;  %v1910_v28 = vld [vmem:[#allocation8 + $0xd8] ss:$12 sps:$4 sm:$0xff]  }
  0x54   :  { %316 = vmatpush1.bf16.msra.mxu0 %v1824_v31  ;;  %357 = vmatpush1.bf16.msra.mxu1 %v1825_v32  ;;  %v1915_v27 = vld [vmem:[#allocation8 + $0x25c] ss:$12 sps:$4 sm:$0xff]   ;;  %v1913_v29 = vld [vmem:[#allocation8 + $0x258] ss:$12 sps:$4 sm:$0xff]   ;;  %v1916_v32 = vld [vmem:[#allocation8 + $0xc0] ss:$12 sps:$4 sm:$0xff]  }
  0x55   :  { %1048 = vmatprep.subr.bf16.mxu0 %v1828_v33  ;;  %1089 = vmatprep.subr.bf16.mxu1 %v1831_v34  ;;  %v1918_v30 = vld [vmem:[#allocation8 + $0xc4] ss:$12 sps:$4 sm:$0xff]   ;;  %v1919_v33 = vld [vmem:[#allocation8 + $0x240] ss:$12 sps:$4 sm:$0xff]   ;;  %s2101_s11 = smov [#allocation11]  }
  0x56   :  { %v1921_v31 = vld [vmem:[#allocation8 + $0x244] ss:$12 sps:$4 sm:$0xff]   ;;  %s1505_s12 = sshll.u32 %s2101_s11, 4  ;;  %s1506_s12 = int_to_ptr.vmem [resolvable:$true] %s1505_s12 }
  0x57   :  { %334 = vmatmul.mubr.bf16.vlgmr.msra.gmra.mxu0 %v86_v35  ;;  %375 = vmatmul.mubr.bf16.vlgmr.msra.gmra.mxu1 %v86_v35  ;;  %v1922_v34 = vld [vmem:[#allocation8 + $0x170] ss:$12 sps:$4 sm:$0xff]   ;;  %s2060_s13 = scalar_lea.vmem %s1506_s12, 128  ;;  %p2065_p7 = scmp.lt.s32.totalorder %s1506_s12, %s1506_s12 }
  0x58   :  { %1049 = vmatpush1.bf16.msra.mxu0 %v1826_v36  ;;  %1090 = vmatpush1.bf16.msra.mxu1 %v1829_v37  ;;  %v1923_v35 = vld [vmem:[#allocation8 + $0x2f0] ss:$12 sps:$4 sm:$0xff]   ;;  %v121_v36 = vlaneseq  ;;  %p2061_p6 = scmp.ne.s32.totalorder %s1506_s12, %s2060_s13  ;;  %p2066_p8 = scmp.lt.s32.totalorder %s2060_s13, %s2060_s13 }
  0x59   :  { %1050 = vmatprep.subr.bf16.mxu0 %v1834_v38  ;;  %1091 = vmatprep.subr.bf16.mxu1 %v1837_v39 }
  0x5a   :  { %v2159_v37 = vshrl.u32 %v121_v36, 7  ;;  %v1957_v36 = vld [vmem:[#allocation9 + $0x30] sm:$0xff]   ;;  %p2067_p9 = por %p2066_p8, %p2065_p7 }
  0x5c   :  { %1051 = vmatpush1.bf16.msra.mxu0 %v1832_v40  ;;  %1092 = vmatpush1.bf16.msra.mxu1 %v1835_v41  ;;  %v123_v38 = vsub.s32 0, %v2159_v37  ;;  %v131_v39 = vsub.s32 2, %v2159_v37  ;;  %v119_v40 = vld [vmem:[%s2203_s3] sm:$0xf]  ;;  %v127_v41 = vsub.s32 1, %v2159_v37  ;;  %p2068_p10 = pnand %p2067_p9, %p2061_p6 }
  0x5d   :  { %1052 = vmatprep.subr.bf16.mxu0 %v1840_v42  ;;  %1093 = vmatprep.subr.bf16.mxu1 %v1843_v43  ;;  %v135_v42 = vsub.s32 3, %v2159_v37  ;;  %v1644_v37 = vld [vmem:[%s2207_s7] ss:$0 sm:$0xff] }
  0x5e   :  { %v124_v43 = vrot.slane %v119_v40, %v123_v38 }
  0x60   :  { %1053 = vmatpush1.bf16.msra.mxu0 %v1838_v44  ;;  %1094 = vmatpush1.bf16.msra.mxu1 %v1841_v45  ;;  %v132_v44 = vrot.slane %v119_v40, %v131_v39  ;;  %v128_v45 = vrot.slane %v119_v40, %v127_v41 }
  0x61   :  { %1054 = vmatprep.subr.bf16.mxu0 %v1846_v46  ;;  %1095 = vmatprep.subr.bf16.mxu1 %v1849_v47  ;;  %v136_v46 = vrot.slane %v119_v40, %v135_v42  ;;  %v1958_v40 = vld [vmem:[#allocation9 + $0x68] sm:$0xff]  }
  0x62   :  { %v1959_v42 = vld [vmem:[#allocation9 + $0x28] sm:$0xff]  }
  0x64   :  { %1055 = vmatpush1.bf16.msra.mxu0 %v1844_v48  ;;  %1096 = vmatpush1.bf16.msra.mxu1 %v1847_v49 }
  0x65   :  { %1056 = vmatprep.subr.bf16.mxu0 %v1852_v50  ;;  %1097 = vmatprep.subr.bf16.mxu1 %v1855_v51 }
  0x68   :  { %1057 = vmatpush1.bf16.msra.mxu0 %v1850_v52  ;;  %1098 = vmatpush1.bf16.msra.mxu1 %v1853_v53 }
  0x69   :  { %1058 = vmatprep.subr.bf16.mxu0 %v1858_v54  ;;  %1099 = vmatprep.subr.bf16.mxu1 %v1861_v55 }
  0x6c   :  { %1059 = vmatpush1.bf16.msra.mxu0 %v1856_v56  ;;  %1100 = vmatpush1.bf16.msra.mxu1 %v1859_v57 }
  0x6d   :  { %1060 = vmatprep.subr.bf16.mxu0 %v1864_v58  ;;  %1101 = vmatprep.subr.bf16.mxu1 %v1867_v59 }
  0x70   :  { %1061 = vmatpush1.bf16.msra.mxu0 %v1862_v60  ;;  %1102 = vmatpush1.bf16.msra.mxu1 %v1865_v61 }
  0x71   :  { %1062 = vmatprep.subr.bf16.mxu0 %v1870_v62  ;;  %1103 = vmatprep.subr.bf16.mxu1 %v1873_v63 }
  0x74   :  { %1063 = vmatpush1.bf16.msra.mxu0 %v1868_v0  ;;  %1104 = vmatpush1.bf16.msra.mxu1 %v1871_v1 }
  0x75   :  { %1064 = vmatprep.subr.bf16.mxu0 %v1876_v2  ;;  %1105 = vmatprep.subr.bf16.mxu1 %v1879_v3  ;;  %v1924_v2 = vld [vmem:[#allocation8 + $0xb0] ss:$12 sps:$4 sm:$0xff]  }
  0x76   :  { %v1925_v3 = vld [vmem:[#allocation8 + $0x230] ss:$12 sps:$4 sm:$0xff]  }
  0x78   :  { %1065 = vmatpush2.bf16.msra.mxu0 %v1874_v4  ;;  %1106 = vmatpush2.bf16.msra.mxu1 %v1877_v5  ;;  %v1926_v5 = vld [vmem:[#allocation8 + $0x158] ss:$12 sps:$4 sm:$0xff]  }
  0x79   :  { %1066 = vmatprep.subr.bf16.mxu0 %v1882_v6  ;;  %1107 = vmatprep.subr.bf16.mxu1 %v1885_v7  ;;  %v1927_v6 = vld [vmem:[#allocation8 + $0x2d8] ss:$12 sps:$4 sm:$0xff]  }
  0x7a   :  { %v1928_v7 = vld [vmem:[#allocation8 + $0x98] ss:$12 sps:$4 sm:$0xff]  }
  0x7c   :  { %1067 = vmatpush2.bf16.msra.mxu0 %v1880_v8  ;;  %1108 = vmatpush2.bf16.msra.mxu1 %v1883_v9  ;;  %v1929_v8 = vld [vmem:[#allocation8 + $0x218] ss:$12 sps:$4 sm:$0xff]   ;;  %v1930_v9 = vld [vmem:[#allocation8 + $0x140] ss:$12 sps:$4 sm:$0xff]  }
  0x7d   :  { %1068 = vmatprep.subr.bf16.mxu0 %v1888_v10  ;;  %1109 = vmatprep.subr.bf16.mxu1 %v1891_v11  ;;  %v1931_v10 = vld [vmem:[#allocation8 + $0x2c0] ss:$12 sps:$4 sm:$0xff]  }
  0x7e   :  { %v1932_v11 = vld [vmem:[#allocation8 + $0x80] ss:$12 sps:$4 sm:$0xff]  }
  0x80   :  { %1069 = vmatpush2.bf16.msra.mxu0 %v1886_v12  ;;  %1110 = vmatpush2.bf16.msra.mxu1 %v1889_v13  ;;  %v1933_v12 = vld [vmem:[#allocation8 + $0x200] ss:$12 sps:$4 sm:$0xff]   ;;  %v1934_v13 = vld [vmem:[#allocation8 + $0x128] ss:$12 sps:$4 sm:$0xff]  }
  0x81   :  { %1070 = vmatprep.subr.bf16.mxu0 %v1894_v14  ;;  %1111 = vmatprep.subr.bf16.mxu1 %v1897_v15  ;;  %v1935_v14 = vld [vmem:[#allocation8 + $0x2a8] ss:$12 sps:$4 sm:$0xff]  }
  0x82   :  { %v1936_v15 = vld [vmem:[#allocation8 + $0x68] ss:$12 sps:$4 sm:$0xff]  }
  0x84   :  { %1071 = vmatpush2.bf16.msra.mxu0 %v1892_v16  ;;  %1112 = vmatpush2.bf16.msra.mxu1 %v1895_v17  ;;  %v1937_v16 = vld [vmem:[#allocation8 + $0x1e8] ss:$12 sps:$4 sm:$0xff]   ;;  %v1938_v17 = vld [vmem:[#allocation8 + $0x110] ss:$12 sps:$4 sm:$0xff]  }
  0x85   :  { %1072 = vmatprep.subr.bf16.mxu0 %v1900_v18  ;;  %1113 = vmatprep.subr.bf16.mxu1 %v1903_v19  ;;  %v1939_v18 = vld [vmem:[#allocation8 + $0x290] ss:$12 sps:$4 sm:$0xff]  }
  0x86   :  { %v1940_v19 = vld [vmem:[#allocation8 + $0x50] ss:$12 sps:$4 sm:$0xff]  }
  0x88   :  { %1073 = vmatpush2.bf16.msra.mxu0 %v1898_v20  ;;  %1114 = vmatpush2.bf16.msra.mxu1 %v1901_v21  ;;  %v1941_v20 = vld [vmem:[#allocation8 + $0x1d0] ss:$12 sps:$4 sm:$0xff]   ;;  %v1942_v21 = vld [vmem:[#allocation8 + $0xf8] ss:$12 sps:$4 sm:$0xff]  }
  0x89   :  { %1074 = vmatprep.subr.bf16.mxu0 %v1906_v22  ;;  %1115 = vmatprep.subr.bf16.mxu1 %v1909_v23  ;;  %v1943_v22 = vld [vmem:[#allocation8 + $0x278] ss:$12 sps:$4 sm:$0xff]  }
  0x8a   :  { %v1944_v23 = vld [vmem:[#allocation8 + $0x38] ss:$12 sps:$4 sm:$0xff]  }
  0x8c   :  { %1075 = vmatpush2.bf16.msra.mxu0 %v1904_v24  ;;  %1116 = vmatpush2.bf16.msra.mxu1 %v1907_v25  ;;  %v1945_v24 = vld [vmem:[#allocation8 + $0x1b8] ss:$12 sps:$4 sm:$0xff]   ;;  %v1946_v25 = vld [vmem:[#allocation8 + $0xe0] ss:$12 sps:$4 sm:$0xff]  }
  0x8d   :  { %1076 = vmatprep.subr.bf16.mxu0 %v1912_v26  ;;  %1117 = vmatprep.subr.bf16.mxu1 %v1915_v27  ;;  %v1947_v26 = vld [vmem:[#allocation8 + $0x260] ss:$12 sps:$4 sm:$0xff]  }
  0x8e   :  { %v1948_v27 = vld [vmem:[#allocation8 + $0x20] ss:$12 sps:$4 sm:$0xff]  }
  0x90   :  { %1077 = vmatpush2.bf16.msra.mxu0 %v1910_v28  ;;  %1118 = vmatpush2.bf16.msra.mxu1 %v1913_v29  ;;  %v1949_v28 = vld [vmem:[#allocation8 + $0x1a0] ss:$12 sps:$4 sm:$0xff]   ;;  %v1950_v29 = vld [vmem:[#allocation8 + $0xc8] ss:$12 sps:$4 sm:$0xff]  }
  0x91   :  { %1078 = vmatprep.subr.bf16.mxu0 %v1918_v30  ;;  %1119 = vmatprep.subr.bf16.mxu1 %v1921_v31  ;;  %v1951_v30 = vld [vmem:[#allocation8 + $0x248] ss:$12 sps:$4 sm:$0xff]  }
  0x92   :  { %v1952_v31 = vld [vmem:[#allocation8 + $0x8] ss:$12 sps:$4 sm:$0xff]  }
  0x94   :  { %1079 = vmatpush2.bf16.msra.mxu0 %v1916_v32  ;;  %1120 = vmatpush2.bf16.msra.mxu1 %v1919_v33  ;;  %v1953_v32 = vld [vmem:[#allocation8 + $0x188] ss:$12 sps:$4 sm:$0xff]   ;;  %v1954_v33 = vld [vmem:[#allocation9 + $0x78] sm:$0xff]  }
  0x95   :  { %1669 = vmatprep.subr.bf16.mxu0 %v1922_v34  ;;  %1691 = vmatprep.subr.bf16.mxu1 %v1923_v35  ;;  %v1955_v34 = vld [vmem:[#allocation9 + $0x38] sm:$0xff]   ;;  %v1956_v35 = vld [vmem:[#allocation9 + $0x70] sm:$0xff]  }
 0x117   :  { %v335_v47 = vpop.f32.mrf.mxu0  ;;  %v376_v48 = vpop.f32.mrf.mxu1 }
 0x118   :  { %v336_v49 = vadd.f32 %v335_v47, %v124_v43  ;;  %v377_v50 = vadd.f32 %v376_v48, %v132_v44  ;;  %v1960_v43 = vld [vmem:[#allocation9 + $0x60] sm:$0xff]   ;;  %v1964_v47 = vld [vmem:[#allocation9 + $0x50] sm:$0xff]  }
 0x119   :  { %v337_v51 = vpop.f32.mrf.mxu0  ;;  %v378_v52 = vpop.f32.mrf.mxu1  ;;  %v1961_v44 = vld [vmem:[#allocation9 + $0x20] sm:$0xff]   ;;  %v1965_v48 = vld [vmem:[#allocation9 + $0x10] sm:$0xff]  }
 0x11a   :  { %v385_v53 = vmax.f32 %v377_v50, 0.0  ;;  %v338_v54 = vadd.f32 %v337_v51, %v128_v45  ;;  %v379_v55 = vadd.f32 %v378_v52, %v136_v46  ;;  %v383_v56 = vmax.f32 %v336_v49, 0.0  ;;  %v1962_v45 = vld [vmem:[#allocation9 + $0x58] sm:$0xff]   ;;  %v1966_v49 = vld [vmem:[#allocation9 + $0x48] sm:$0xff]   ;;  %v1968_v51 = vld [vmem:[#allocation9 + $0x40] sm:$0xff]  }
 0x11b   :  { %v339_v57 = vpop.f32.mrf.mxu0  ;;  %v380_v58 = vpop.f32.mrf.mxu1  ;;  %v1963_v46 = vld [vmem:[#allocation9 + $0x18] sm:$0xff]   ;;  %v1967_v50 = vld [vmem:[#allocation9 + $0x8] sm:$0xff]   ;;  %v1969_v52 = vld [vmem:[#allocation9] sm:$0xff]  }
 0x11c   :  { %v384_v59 = vmax.f32 %v338_v54, 0.0  ;;  %v386_v60 = vmax.f32 %v379_v55, 0.0  ;;  %v2174_v61 = vpack.c.bf16 %v385_v53, %v385_v53  ;;  %v2176_v4 = vpack.c.bf16 %v383_v56, %v383_v56  ;;  %v1970_v53 = vld [vmem:[#allocation9 + $0xb8] sm:$0xff]   ;;  %v1971_v55 = vld [vmem:[#allocation9 + $0xb0] sm:$0xff]   ;;  %v1972_v56 = vld [vmem:[#allocation9 + $0xa8] sm:$0xff]  }
 0x11d   :  { %v340_v62 = vpop.f32.mrf.mxu0  ;;  %v381_v63 = vpop.f32.mrf.mxu1  ;;  %v2099_v54 = vmov 0.0   ;;  %v1973_v57 = vld [vmem:[#allocation9 + $0xa0] sm:$0xff]   ;;  %v1974_v58 = vld [vmem:[#allocation9 + $0x98] sm:$0xff]  }
 0x11e   :  { %v388_v0 = vpack.c.bf16 %v384_v59, %v384_v59  ;;  %v390_v1 = vpack.c.bf16 %v386_v60, %v386_v60  ;;  %v1975_v59 = vld [vmem:[#allocation9 + $0x90] sm:$0xff]   ;;  %v1976_v60 = vld [vmem:[#allocation9 + $0x88] sm:$0xff]   ;;  %v519_v62 = vld [vmem:[%s2205_s5] sm:$0x7] }
 0x11f   :  { %v524_v63 = vrot.slane %v519_v62, %v123_v38 }
 0x120   :  { %1080 = vmatprep.mubr.bf16.mxu0 %v388_v0  ;;  %1121 = vmatprep.mubr.bf16.mxu1 %v390_v1 }
 0x121   :  { %1081 = vmatmul.mubr.bf16.vlgmr.msra.gmra.mxu0 %v2176_v4  ;;  %1122 = vmatmul.mubr.bf16.vlgmr.msra.gmra.mxu1 %v2174_v61 }
 0x122   :  { %1670 = vmatpush3.bf16.msra.mxu0 %v1924_v2  ;;  %1692 = vmatpush3.bf16.msra.mxu1 %v1925_v3 }
 0x123   :  { %1162 = vmatprep.mubr.bf16.mxu0 %v388_v0  ;;  %1202 = vmatprep.mubr.bf16.mxu1 %v390_v1  ;;  %v528_v0 = vrot.slane %v519_v62, %v127_v41 }
 0x124   :  { %1671 = vmatprep.subr.bf16.mxu0 %v1926_v5  ;;  %1693 = vmatprep.subr.bf16.mxu1 %v1927_v6 }
 0x126   :  { %1672 = vmatpush3.bf16.msra.mxu0 %v1928_v7  ;;  %1694 = vmatpush3.bf16.msra.mxu1 %v1929_v8 }
 0x127   :  { %1673 = vmatprep.subr.bf16.mxu0 %v1930_v9  ;;  %1695 = vmatprep.subr.bf16.mxu1 %v1931_v10 }
 0x12a   :  { %1674 = vmatpush3.bf16.msra.mxu0 %v1932_v11  ;;  %1696 = vmatpush3.bf16.msra.mxu1 %v1933_v12 }
 0x12b   :  { %1675 = vmatprep.subr.bf16.mxu0 %v1934_v13  ;;  %1697 = vmatprep.subr.bf16.mxu1 %v1935_v14 }
 0x12e   :  { %1676 = vmatpush3.bf16.msra.mxu0 %v1936_v15  ;;  %1698 = vmatpush3.bf16.msra.mxu1 %v1937_v16 }
 0x12f   :  { %1677 = vmatprep.subr.bf16.mxu0 %v1938_v17  ;;  %1699 = vmatprep.subr.bf16.mxu1 %v1939_v18  ;;  %v532_v17 = vrot.slane %v519_v62, %v131_v39 }
 0x132   :  { %1678 = vmatpush3.bf16.msra.mxu0 %v1940_v19  ;;  %1700 = vmatpush3.bf16.msra.mxu1 %v1941_v20 }
 0x133   :  { %1679 = vmatprep.subr.bf16.mxu0 %v1942_v21  ;;  %1701 = vmatprep.subr.bf16.mxu1 %v1943_v22 }
 0x136   :  { %1680 = vmatpush3.bf16.msra.mxu0 %v1944_v23  ;;  %1702 = vmatpush3.bf16.msra.mxu1 %v1945_v24 }
 0x137   :  { %1681 = vmatprep.subr.bf16.mxu0 %v1946_v25  ;;  %1703 = vmatprep.subr.bf16.mxu1 %v1947_v26 }
 0x13a   :  { %1682 = vmatpush3.bf16.msra.mxu0 %v1948_v27  ;;  %1704 = vmatpush3.bf16.msra.mxu1 %v1949_v28 }
 0x13b   :  { %1683 = vmatprep.subr.bf16.mxu0 %v1950_v29  ;;  %1705 = vmatprep.subr.bf16.mxu1 %v1951_v30 }
 0x13e   :  { %1684 = vmatpush3.bf16.msra.mxu0 %v1952_v31  ;;  %1706 = vmatpush3.bf16.msra.mxu1 %v1953_v32 }
 0x13f   :  { %1713 = vmatprep.subr.bf16.mxu0 %v1954_v33  ;;  %1744 = vmatprep.subr.bf16.mxu1 %v2099_v54 }
 0x141   :  { %1163 = vmatmul.mubr.bf16.vlgmr.msra.gmra.mxu0 %v2176_v4  ;;  %1203 = vmatmul.mubr.bf16.vlgmr.msra.gmra.mxu1 %v2174_v61  ;;  %v1977_v61 = vld [vmem:[#allocation9 + $0x80] sm:$0xff]  }
 0x142   :  { %1714 = vmatpush3.bf16.msra.mxu0 %v1955_v34  ;;  %1745 = vmatpush3.bf16.msra.mxu1 %v1970_v53 }
 0x143   :  { %1715 = vmatprep.subr.bf16.mxu0 %v1956_v35  ;;  %1746 = vmatprep.subr.bf16.mxu1 %v2099_v54 }
 0x144   :  { %1760 = vmatprep.mubr.msk.bf16.mxu1 %vm2100_vm0, %v2099_v54 }
 0x146   :  { %1716 = vmatpush3.bf16.msra.mxu0 %v1957_v36  ;;  %1747 = vmatpush3.bf16.msra.mxu1 %v1971_v55 }
 0x147   :  { %1717 = vmatprep.subr.bf16.mxu0 %v1958_v40  ;;  %1748 = vmatprep.subr.bf16.mxu1 %v2099_v54 }
 0x14a   :  { %1718 = vmatpush3.bf16.msra.mxu0 %v1959_v42  ;;  %1749 = vmatpush3.bf16.msra.mxu1 %v1972_v56 }
 0x14b   :  { %1719 = vmatprep.subr.bf16.mxu0 %v1960_v43  ;;  %1750 = vmatprep.subr.bf16.mxu1 %v2099_v54 }
 0x14e   :  { %1720 = vmatpush3.bf16.msra.mxu0 %v1961_v44  ;;  %1751 = vmatpush3.bf16.msra.mxu1 %v1973_v57  ;;  %v1496_v44 = vstv %s2200_s0 }
 0x14f   :  { %1721 = vmatprep.subr.bf16.mxu0 %v1962_v45  ;;  %1752 = vmatprep.subr.bf16.mxu1 %v2099_v54 }
 0x152   :  { %1722 = vmatpush3.bf16.msra.mxu0 %v1963_v46  ;;  %1753 = vmatpush3.bf16.msra.mxu1 %v1974_v58 }
 0x153   :  { %1723 = vmatprep.subr.bf16.mxu0 %v1964_v47  ;;  %1754 = vmatprep.subr.bf16.mxu1 %v2099_v54 }
 0x156   :  { %1724 = vmatpush3.bf16.msra.mxu0 %v1965_v48  ;;  %1755 = vmatpush3.bf16.msra.mxu1 %v1975_v59 }
 0x157   :  { %1725 = vmatprep.subr.bf16.mxu0 %v1966_v49  ;;  %1756 = vmatprep.subr.bf16.mxu1 %v2099_v54 }
 0x15a   :  { %1726 = vmatpush3.bf16.msra.mxu0 %v1967_v50  ;;  %1757 = vmatpush3.bf16.msra.mxu1 %v1976_v60 }
 0x15b   :  { %1727 = vmatprep.subr.bf16.mxu0 %v1968_v51  ;;  %1758 = vmatprep.subr.bf16.mxu1 %v2099_v54 }
 0x15e   :  { %1728 = vmatpush3.bf16.msra.mxu0 %v1969_v52  ;;  %1759 = vmatpush3.bf16.msra.mxu1 %v1977_v61 }
 0x1e1   :  { %v1082_v1 = vpop.f32.mrf.mxu0  ;;  %v1123_v2 = vpop.f32.mrf.mxu1 }
 0x1e2   :  { %v1083_v3 = vadd.f32 %v1082_v1, %v524_v63 }
 0x1e3   :  { %v1084_v4 = vpop.f32.mrf.mxu0  ;;  %v1125_v5 = vpop.f32.mrf.mxu1 }
 0x1e4   :  { %v1124_v6 = vadd.f32 %v1123_v2, %v1083_v3  ;;  %v1085_v7 = vadd.f32 %v1084_v4, %v528_v0 }
 0x1e5   :  { %v1086_v8 = vpop.f32.mrf.mxu0  ;;  %v1127_v9 = vpop.f32.mrf.mxu1 }
 0x1e6   :  { %v1126_v10 = vadd.f32 %v1125_v5, %v1085_v7  ;;  %v1210_v11 = vmax.f32 %v1124_v6, 0.0 }
 0x1e7   :  { %v1087_v12 = vpop.f32.mrf.mxu0  ;;  %v1128_v13 = vpop.f32.mrf.mxu1 }
 0x1e8   :  { %v1211_v14 = vmax.f32 %v1126_v10, 0.0  ;;  %v1213_v16 = vpack.c.bf16 %v1210_v11, %v1210_v11 }
 0x1ea   :  { %v1214_v15 = vpack.c.bf16 %v1211_v14, %v1211_v14 }
 0x1ec   :  { %1447 = vmatprep.mubr.bf16.mxu0 %v1214_v15 }
 0x1ed   :  { %1448 = vmatmul.mubr.bf16.vlgmr.msra.gmra.mxu0 %v1213_v16 }
 0x201   :  { %v1685_v38 = vpop.f32.mrf.mxu0  ;;  %v1707_v41 = vpop.f32.mrf.mxu1 }
 0x203   :  { %v1686_v18 = vpop.f32.mrf.mxu0  ;;  %v1708_v19 = vpop.f32.mrf.mxu1 }
 0x204   :  { %v1687_v20 = vadd.f32 %v1686_v18, %v1685_v38  ;;  %v1709_v24 = vadd.f32 %v1708_v19, %v1707_v41 }
 0x205   :  { %v1688_v21 = vpop.f32.mrf.mxu0  ;;  %v1710_v22 = vpop.f32.mrf.mxu1 }
 0x206   :  { %v1165_v23 = vadd.f32 %v1687_v20, %v532_v17 }
 0x207   :  { %v1689_v25 = vpop.f32.mrf.mxu0  ;;  %v1711_v26 = vpop.f32.mrf.mxu1 }
 0x208   :  { %v1205_v27 = vadd.f32 %v1709_v24, %v1165_v23 }
 0x20a   :  { %v1212_v28 = vmax.f32 %v1205_v27, 0.0 }
 0x20c   :  { %v1215_v29 = vpack.c.bf16 %v1212_v28, %v1212_v28 }
 0x20e   :  { %1761 = vmatmul.mubr.bf16.vlgmr.msra.gmra.mxu1 %v1215_v29 }
 0x2ad   :  { %v1729_v30 = vpop.f32.mrf.mxu0 }
 0x2af   :  { %v1730_v31 = vpop.f32.mrf.mxu0 }
 0x2b0   :  { %v1731_v34 = vadd.f32 %v1730_v31, %v1729_v30 }
 0x2b1   :  { %v1732_v32 = vpop.f32.mrf.mxu0 }
 0x2b2   :  { %v1450_v39 = vadd.f32 %v1731_v34, %v1644_v37 }
 0x2b3   :  { %v1733_v33 = vpop.f32.mrf.mxu0 }
 0x2ce   :  { %v1489_v35 = vpop.f32.mrf.mxu1 }
 0x2cf   :  { %v1490_v36 = vadd.f32 %v1489_v35, %v1450_v39 }
 0x2d0   :  { %v1762_v40 = vpop.f32.mrf.mxu1 }
 0x2d1   :  { %1978 = vtanh.f32 %v1490_v36 }
 0x2d2   :  { %v1492_v42 = vpop.f32.mrf.mxu1 }
 0x2d4   :  { %v1763_v43 = vpop.f32.mrf.mxu1 }
 0x2de   :  { %v1979_v45 = vpop.eup %1978 }
 0x2df   :  { %v1497_v46 = vmul.f32 %v1979_v45, %v1496_v44 }
 0x2e1   :  { %1498 = vst [vmem:[#allocation11] sm:$0xff] %v1497_v46 }
 0x2e2   :  { %2071 = shalt.err (!%p2068_p10)
}
 0x2e3   :  { %1508 = dma.vmem_to_hbm [thread:$0]  %s1506_s12, 128, %s2208_s8, [#allocation5]  }
 0x2e4   :  { %2086 = dma.done.wait [#allocation5], 128  }
 0x2e5   :  { %2087 = vsyncadd [#allocation5], 4294967168 }
 0x2e6   :  { %1512 = vsyncpa [#allocation4], 1 }
 0x2e7   :  { %1513 = vsyncpa [#allocation7], 1 }
 0x2e8   :  { %1514 = vsyncpa [#allocation10], 1 }
 0x2e9   :  { %1515 = vsyncpa [#allocation5], 1 }

</bundles_post_ra>
